<compile_context>
chip_gen: v5e
topology: v5e:2x2
jax: 0.10.0
libtpu: 0.0.40
codegen_flags: <defaults>
</compile_context>

<pallas_src>
import jax
import jax.numpy as jnp
from jax import lax
from jax.experimental import pallas as pl
from jax.experimental.pallas import tpu as pltpu


# ---------------------------------------------------------------------------
# Fused forward kernel
# ---------------------------------------------------------------------------
def _make_fused_kernel(N, H, W, K, D, NN):
    HW = H * W

    def kernel(x_ref, wblk_ref, w1_ref, b1_ref, w2_ref, b2_ref, o_ref):
        # ---- In-VMEM patch extraction (XLU lane rolls) -------------------
        # x_ref: (N*C, H*W) f32, rows = (n, c), lanes = h*W + w.
        # Tap (kh, kw) -> roll lanes by s = kh*W + kw so x[n, c, h+kh, w+kw]
        # lands on output lane h*W + w.  Wrapped / out-of-window lanes only
        # hit (h, w) positions whose FC1 columns are zero, so they never
        # contribute and need no masking.
        x2d = x_ref[...]
        taps = []
        for kh in range(K):
            for kw in range(K):
                s = kh * W + kw
                taps.append(x2d if s == 0 else pltpu.roll(x2d, shift=HW - s, axis=1))
        taps.append(jnp.ones((1, HW), jnp.float32))          # ones row: conv bias column
        sstack = jnp.concatenate(taps, axis=0).astype(jnp.bfloat16)   # (K*K*N*C+1, HW)

        # ---- Conv for ALL channels in ONE MXU matmul ----------------------
        # wblk rows are (d, n); conv bias folded into the last column.
        conv = jnp.dot(wblk_ref[...], sstack,
                       preferred_element_type=jnp.float32)            # (D*N, HW)
        conv = jnp.maximum(conv, 0.0)                                  # Conv ReLU (one pass)

        # ---- Flatten + Linear1: partial contraction per conv channel ------
        # PyTorch flatten order (d, ho, wo) is encoded in w1_ref[d] (HW, NN)
        # with zero padding on out-of-window lanes.
        acc = jnp.zeros((N, NN), jnp.float32)
        for d in range(D):
            lhs = conv[d * N:(d + 1) * N, :].astype(jnp.bfloat16)      # (N, HW)
            acc = acc + jnp.dot(lhs, w1_ref[d],
                                preferred_element_type=jnp.float32)    # (N, NN)

        # ---- Epilogue: bias + ReLU, Linear2 + bias + ReLU (f32, tiny) -----
        h1 = jnp.maximum(acc + b1_ref[...], 0.0)
        h2 = jnp.dot(h1, w2_ref[...], preferred_element_type=jnp.float32) + b2_ref[...]
        o_ref[...] = jnp.maximum(h2, 0.0)

    return kernel


def _full_spec(shape):
    # Whole array as a single block (everything here fits VMEM trivially).
    return pl.BlockSpec(shape, lambda i: (0,) * len(shape))


def build_forward(N, C, H, W, K, D, NN, n_out):
    kernel = _make_fused_kernel(N, H, W, K, D, NN)

    def forward(x, prepped):
        wblk, w1s, b1, w2t, b2 = prepped
        x2d = x.reshape(N * C, H * W)          # pure row-major collapse (free)
        return pl.pallas_call(
            kernel,
            grid=(1,),
            in_specs=[_full_spec(x2d.shape), _full_spec(wblk.shape),
                      _full_spec(w1s.shape), _full_spec(b1.shape),
                      _full_spec(w2t.shape), _full_spec(b2.shape)],
            out_specs=_full_spec((N, n_out)),
            out_shape=jax.ShapeDtypeStruct((N, n_out), jnp.float32),
            compiler_params=pltpu.CompilerParams(
                dimension_semantics=("arbitrary",)),
        )(x2d, wblk, w1s, b1, w2t, b2)

    # TODO(synk): for large batch, tile the batch axis with a "parallel" grid
    # (megacore) and size blocks against the 64 MiB v7x VMEM; not needed at N=2.
    return jax.jit(forward)


# ---------------------------------------------------------------------------
# One-time parameter preparation (hoisted out of the hot path)
# ---------------------------------------------------------------------------
def prepare_params(params, N, C, H, W, K):
    wc, bc, w1, b1, w2, b2 = params
    D = wc.shape[0]
    NN = w1.shape[0]
    Ho, Wo = H - K + 1, W - K + 1

    # Conv weight: one (D*N, K*K*N*C + 1) batch-block-diagonal matrix; rows
    # ordered (d, n), columns ordered ((kh,kw), n, c); last column = conv bias.
    # NOTE: built for this batch size N (rebuild if N changes).
    wt = wc.reshape(D, C, K * K).transpose(0, 2, 1)                     # (D, K*K, C)
    blk = jnp.einsum('dtc,mn->dmtnc', wt, jnp.eye(N, dtype=wc.dtype))   # (D, N, K*K, N, C)
    blk = blk.reshape(D, N, K * K * N * C)
    wblk = jnp.concatenate(
        [blk, jnp.broadcast_to(bc[:, None, None], (D, N, 1))], axis=-1)
    wblk = wblk.reshape(D * N, K * K * N * C + 1).astype(jnp.bfloat16)  # (D*N, R)

    # FC1 weight: PyTorch flatten order (d, ho, wo) re-indexed onto the kernel's
    # h*W + w conv lanes; padding columns (h >= Ho or w >= Wo) are zero so
    # out-of-window / roll-wrapped conv lanes never contribute.
    w1r = w1.reshape(NN, D, Ho, Wo).transpose(1, 2, 3, 0)               # (D, Ho, Wo, NN)
    w1s = jnp.pad(w1r, ((0, 0), (0, H - Ho), (0, W - Wo), (0, 0)))
    w1s = w1s.reshape(D, H * W, NN).astype(jnp.bfloat16)                # (D, H*W, NN)

    return (wblk, w1s,
            b1.reshape(1, NN).astype(jnp.float32),
            w2.T.astype(jnp.float32),
            b2.reshape(1, -1).astype(jnp.float32))


# ---------------------------------------------------------------------------
# Pure-JAX reference mirroring the PyTorch module exactly
# ---------------------------------------------------------------------------
def torch_reference(x, params):
    wc, bc, w1, b1, w2, b2 = params
    y = lax.conv_general_dilated(
        x, wc, window_strides=(1, 1), padding="VALID",
        dimension_numbers=("NCHW", "OIHW", "NCHW"),
        precision=lax.Precision.HIGHEST)
    y = jax.nn.relu(y + bc[None, :, None, None])
    y = y.reshape(x.shape[0], -1)                          # nn.Flatten (N, D*Ho*Wo)
    y = jax.nn.relu(y @ w1.T + b1)
    y = jax.nn.relu(y @ w2.T + b2)
    return y


if __name__ == "__main__":
    # Module hyper-params (small, consistent with the PyTorch __init__)
    batch = 2
    in_channels, in_h, in_w = 4, 16, 16
    kernel_size = 3
    depth = 8
    n_neurons = 32
    n_out = 10
    flat = depth * (in_h - kernel_size + 1) * (in_w - kernel_size + 1)

    key = jax.random.PRNGKey(0)
    kx, k0, k1, k2, k3, k4, k5 = jax.random.split(key, 7)

    x = jax.random.normal(kx, (batch, in_channels, in_h, in_w), jnp.float32)

    # Deterministic synthetic parameters (PyTorch parameter shapes)
    wc = 0.10 * jax.random.normal(k0, (depth, in_channels, kernel_size, kernel_size), jnp.float32)
    bc = 0.10 * jax.random.normal(k1, (depth,), jnp.float32)
    w1 = 0.02 * jax.random.normal(k2, (n_neurons, flat), jnp.float32)
    b1 = 0.10 * jax.random.normal(k3, (n_neurons,), jnp.float32)
    w2 = 0.10 * jax.random.normal(k4, (n_out, n_neurons), jnp.float32)
    b2 = 0.10 * jax.random.normal(k5, (n_out,), jnp.float32)
    params = (wc, bc, w1, b1, w2, b2)

    # One-time weight re-layout (outside the hot path)
    prepped = prepare_params(params, batch, in_channels, in_h, in_w, kernel_size)
    forward = build_forward(batch, in_channels, in_h, in_w,
                            kernel_size, depth, n_neurons, n_out)

    out = jax.block_until_ready(forward(x, prepped))
    ref = jax.block_until_ready(torch_reference(x, params))

    assert out.shape == (batch, n_out), out.shape
    assert jnp.allclose(out, ref, atol=2e-2, rtol=2e-2), (
        f"mismatch: max abs err {jnp.max(jnp.abs(out - ref))}")

    print("KERNEL_OK")
</pallas_src>

<mosaic_0001>
module attributes {stable_mosaic.version = 11 : i64} {
  func.func @kernel(%arg0: i32, %arg1: memref<8x256xf32, #tpu.memory_space<vmem>>, %arg2: memref<16x73xbf16, #tpu.memory_space<vmem>>, %arg3: memref<8x256x32xbf16, #tpu.memory_space<vmem>>, %arg4: memref<1x32xf32, #tpu.memory_space<vmem>>, %arg5: memref<32x10xf32, #tpu.memory_space<vmem>>, %arg6: memref<1x10xf32, #tpu.memory_space<vmem>>, %arg7: memref<2x10xf32, #tpu.memory_space<vmem>>) attributes {dimension_semantics = [#tpu.dimension_semantics<arbitrary>], iteration_bounds = array<i64: 1>, scalar_prefetch = 0 : i64, scratch_operands = 0 : i64, tpu.core_type = #tpu.core_type<tc>, window_params = [{pipeline_mode = #tpu.pipeline_mode<synchronous>, transform_indices = @transform_0, window_bounds = array<i64: 8, 256>}, {pipeline_mode = #tpu.pipeline_mode<synchronous>, transform_indices = @transform_1, window_bounds = array<i64: 16, 73>}, {pipeline_mode = #tpu.pipeline_mode<synchronous>, transform_indices = @transform_2, window_bounds = array<i64: 8, 256, 32>}, {pipeline_mode = #tpu.pipeline_mode<synchronous>, transform_indices = @transform_3, window_bounds = array<i64: 1, 32>}, {pipeline_mode = #tpu.pipeline_mode<synchronous>, transform_indices = @transform_4, window_bounds = array<i64: 32, 10>}, {pipeline_mode = #tpu.pipeline_mode<synchronous>, transform_indices = @transform_5, window_bounds = array<i64: 1, 10>}, {pipeline_mode = #tpu.pipeline_mode<synchronous>, transform_indices = @transform_6, window_bounds = array<i64: 2, 10>}]} {
    %c0 = arith.constant 0 : index
    %c0_0 = arith.constant 0 : index
    %0 = vector.load %arg1[%c0, %c0_0] : memref<8x256xf32, #tpu.memory_space<vmem>>, vector<8x256xf32>
    %c255_i32 = arith.constant 255 : i32
    %1 = tpu.dynamic_rotate %0 by %c255_i32 dim 1 : vector<8x256xf32>, i32 -> vector<8x256xf32>
    %c254_i32 = arith.constant 254 : i32
    %2 = tpu.dynamic_rotate %0 by %c254_i32 dim 1 : vector<8x256xf32>, i32 -> vector<8x256xf32>
    %c240_i32 = arith.constant 240 : i32
    %3 = tpu.dynamic_rotate %0 by %c240_i32 dim 1 : vector<8x256xf32>, i32 -> vector<8x256xf32>
    %c239_i32 = arith.constant 239 : i32
    %4 = tpu.dynamic_rotate %0 by %c239_i32 dim 1 : vector<8x256xf32>, i32 -> vector<8x256xf32>
    %c238_i32 = arith.constant 238 : i32
    %5 = tpu.dynamic_rotate %0 by %c238_i32 dim 1 : vector<8x256xf32>, i32 -> vector<8x256xf32>
    %c224_i32 = arith.constant 224 : i32
    %6 = tpu.dynamic_rotate %0 by %c224_i32 dim 1 : vector<8x256xf32>, i32 -> vector<8x256xf32>
    %c223_i32 = arith.constant 223 : i32
    %7 = tpu.dynamic_rotate %0 by %c223_i32 dim 1 : vector<8x256xf32>, i32 -> vector<8x256xf32>
    %c222_i32 = arith.constant 222 : i32
    %8 = tpu.dynamic_rotate %0 by %c222_i32 dim 1 : vector<8x256xf32>, i32 -> vector<8x256xf32>
    %cst = arith.constant 1.000000e+00 : f32
    %9 = vector.broadcast %cst : f32 to vector<1x256xf32>
    %10 = tpu.concatenate %0, %1, %2, %3, %4, %5, %6, %7, %8, %9 in 0 : vector<8x256xf32>, vector<8x256xf32>, vector<8x256xf32>, vector<8x256xf32>, vector<8x256xf32>, vector<8x256xf32>, vector<8x256xf32>, vector<8x256xf32>, vector<8x256xf32>, vector<1x256xf32> -> vector<73x256xf32>
    %11 = arith.truncf %10 : vector<73x256xf32> to vector<73x256xbf16>
    %c0_1 = arith.constant 0 : index
    %c0_2 = arith.constant 0 : index
    %12 = vector.load %arg2[%c0_1, %c0_2] : memref<16x73xbf16, #tpu.memory_space<vmem>>, vector<16x73xbf16>
    %cst_3 = arith.constant dense<0.000000e+00> : vector<16x256xf32>
    %13 = tpu.matmul %12, %11, %cst_3 {dimension_numbers = #tpu.dot_dimension_numbers<[1], [0], [0], [1], [0, 0, 1, 1], [], []>} : vector<16x73xbf16>, vector<73x256xbf16>, vector<16x256xf32> -> vector<16x256xf32>
    %cst_4 = arith.constant 0.000000e+00 : f32
    %14 = vector.broadcast %cst_4 : f32 to vector<16x256xf32>
    %15 = arith.maximumf %13, %14 : vector<16x256xf32>
    %cst_5 = arith.constant 0.000000e+00 : f32
    %16 = vector.broadcast %cst_5 : f32 to vector<2x32xf32>
    %17 = vector.extract_strided_slice %15 {offsets = [0, 0], sizes = [2, 256], strides = [1, 1]} : vector<16x256xf32> to vector<2x256xf32>
    %18 = arith.truncf %17 : vector<2x256xf32> to vector<2x256xbf16>
    %c0_6 = arith.constant 0 : index
    %c0_7 = arith.constant 0 : index
    %c0_8 = arith.constant 0 : index
    %19 = vector.load %arg3[%c0_6, %c0_7, %c0_8] : memref<8x256x32xbf16, #tpu.memory_space<vmem>>, vector<1x256x32xbf16>
    %20 = vector.shape_cast %19 : vector<1x256x32xbf16> to vector<256x32xbf16>
    %cst_9 = arith.constant dense<0.000000e+00> : vector<2x32xf32>
    %21 = tpu.matmul %18, %20, %cst_9 {dimension_numbers = #tpu.dot_dimension_numbers<[1], [0], [0], [1], [0, 0, 1, 1], [], []>} : vector<2x256xbf16>, vector<256x32xbf16>, vector<2x32xf32> -> vector<2x32xf32>
    %22 = arith.addf %16, %21 : vector<2x32xf32>
    %23 = vector.extract_strided_slice %15 {offsets = [2, 0], sizes = [2, 256], strides = [1, 1]} : vector<16x256xf32> to vector<2x256xf32>
    %24 = arith.truncf %23 : vector<2x256xf32> to vector<2x256xbf16>
    %c1 = arith.constant 1 : index
    %c0_10 = arith.constant 0 : index
    %c0_11 = arith.constant 0 : index
    %25 = vector.load %arg3[%c1, %c0_10, %c0_11] : memref<8x256x32xbf16, #tpu.memory_space<vmem>>, vector<1x256x32xbf16>
    %26 = vector.shape_cast %25 : vector<1x256x32xbf16> to vector<256x32xbf16>
    %cst_12 = arith.constant dense<0.000000e+00> : vector<2x32xf32>
    %27 = tpu.matmul %24, %26, %cst_12 {dimension_numbers = #tpu.dot_dimension_numbers<[1], [0], [0], [1], [0, 0, 1, 1], [], []>} : vector<2x256xbf16>, vector<256x32xbf16>, vector<2x32xf32> -> vector<2x32xf32>
    %28 = arith.addf %22, %27 : vector<2x32xf32>
    %29 = vector.extract_strided_slice %15 {offsets = [4, 0], sizes = [2, 256], strides = [1, 1]} : vector<16x256xf32> to vector<2x256xf32>
    %30 = arith.truncf %29 : vector<2x256xf32> to vector<2x256xbf16>
    %c2 = arith.constant 2 : index
    %c0_13 = arith.constant 0 : index
    %c0_14 = arith.constant 0 : index
    %31 = vector.load %arg3[%c2, %c0_13, %c0_14] : memref<8x256x32xbf16, #tpu.memory_space<vmem>>, vector<1x256x32xbf16>
    %32 = vector.shape_cast %31 : vector<1x256x32xbf16> to vector<256x32xbf16>
    %cst_15 = arith.constant dense<0.000000e+00> : vector<2x32xf32>
    %33 = tpu.matmul %30, %32, %cst_15 {dimension_numbers = #tpu.dot_dimension_numbers<[1], [0], [0], [1], [0, 0, 1, 1], [], []>} : vector<2x256xbf16>, vector<256x32xbf16>, vector<2x32xf32> -> vector<2x32xf32>
    %34 = arith.addf %28, %33 : vector<2x32xf32>
    %35 = vector.extract_strided_slice %15 {offsets = [6, 0], sizes = [2, 256], strides = [1, 1]} : vector<16x256xf32> to vector<2x256xf32>
    %36 = arith.truncf %35 : vector<2x256xf32> to vector<2x256xbf16>
    %c3 = arith.constant 3 : index
    %c0_16 = arith.constant 0 : index
    %c0_17 = arith.constant 0 : index
    %37 = vector.load %arg3[%c3, %c0_16, %c0_17] : memref<8x256x32xbf16, #tpu.memory_space<vmem>>, vector<1x256x32xbf16>
    %38 = vector.shape_cast %37 : vector<1x256x32xbf16> to vector<256x32xbf16>
    %cst_18 = arith.constant dense<0.000000e+00> : vector<2x32xf32>
    %39 = tpu.matmul %36, %38, %cst_18 {dimension_numbers = #tpu.dot_dimension_numbers<[1], [0], [0], [1], [0, 0, 1, 1], [], []>} : vector<2x256xbf16>, vector<256x32xbf16>, vector<2x32xf32> -> vector<2x32xf32>
    %40 = arith.addf %34, %39 : vector<2x32xf32>
    %41 = vector.extract_strided_slice %15 {offsets = [8, 0], sizes = [2, 256], strides = [1, 1]} : vector<16x256xf32> to vector<2x256xf32>
    %42 = arith.truncf %41 : vector<2x256xf32> to vector<2x256xbf16>
    %c4 = arith.constant 4 : index
    %c0_19 = arith.constant 0 : index
    %c0_20 = arith.constant 0 : index
    %43 = vector.load %arg3[%c4, %c0_19, %c0_20] : memref<8x256x32xbf16, #tpu.memory_space<vmem>>, vector<1x256x32xbf16>
    %44 = vector.shape_cast %43 : vector<1x256x32xbf16> to vector<256x32xbf16>
    %cst_21 = arith.constant dense<0.000000e+00> : vector<2x32xf32>
    %45 = tpu.matmul %42, %44, %cst_21 {dimension_numbers = #tpu.dot_dimension_numbers<[1], [0], [0], [1], [0, 0, 1, 1], [], []>} : vector<2x256xbf16>, vector<256x32xbf16>, vector<2x32xf32> -> vector<2x32xf32>
    %46 = arith.addf %40, %45 : vector<2x32xf32>
    %47 = vector.extract_strided_slice %15 {offsets = [10, 0], sizes = [2, 256], strides = [1, 1]} : vector<16x256xf32> to vector<2x256xf32>
    %48 = arith.truncf %47 : vector<2x256xf32> to vector<2x256xbf16>
    %c5 = arith.constant 5 : index
    %c0_22 = arith.constant 0 : index
    %c0_23 = arith.constant 0 : index
    %49 = vector.load %arg3[%c5, %c0_22, %c0_23] : memref<8x256x32xbf16, #tpu.memory_space<vmem>>, vector<1x256x32xbf16>
    %50 = vector.shape_cast %49 : vector<1x256x32xbf16> to vector<256x32xbf16>
    %cst_24 = arith.constant dense<0.000000e+00> : vector<2x32xf32>
    %51 = tpu.matmul %48, %50, %cst_24 {dimension_numbers = #tpu.dot_dimension_numbers<[1], [0], [0], [1], [0, 0, 1, 1], [], []>} : vector<2x256xbf16>, vector<256x32xbf16>, vector<2x32xf32> -> vector<2x32xf32>
    %52 = arith.addf %46, %51 : vector<2x32xf32>
    %53 = vector.extract_strided_slice %15 {offsets = [12, 0], sizes = [2, 256], strides = [1, 1]} : vector<16x256xf32> to vector<2x256xf32>
    %54 = arith.truncf %53 : vector<2x256xf32> to vector<2x256xbf16>
    %c6 = arith.constant 6 : index
    %c0_25 = arith.constant 0 : index
    %c0_26 = arith.constant 0 : index
    %55 = vector.load %arg3[%c6, %c0_25, %c0_26] : memref<8x256x32xbf16, #tpu.memory_space<vmem>>, vector<1x256x32xbf16>
    %56 = vector.shape_cast %55 : vector<1x256x32xbf16> to vector<256x32xbf16>
    %cst_27 = arith.constant dense<0.000000e+00> : vector<2x32xf32>
    %57 = tpu.matmul %54, %56, %cst_27 {dimension_numbers = #tpu.dot_dimension_numbers<[1], [0], [0], [1], [0, 0, 1, 1], [], []>} : vector<2x256xbf16>, vector<256x32xbf16>, vector<2x32xf32> -> vector<2x32xf32>
    %58 = arith.addf %52, %57 : vector<2x32xf32>
    %59 = vector.extract_strided_slice %15 {offsets = [14, 0], sizes = [2, 256], strides = [1, 1]} : vector<16x256xf32> to vector<2x256xf32>
    %60 = arith.truncf %59 : vector<2x256xf32> to vector<2x256xbf16>
    %c7 = arith.constant 7 : index
    %c0_28 = arith.constant 0 : index
    %c0_29 = arith.constant 0 : index
    %61 = vector.load %arg3[%c7, %c0_28, %c0_29] : memref<8x256x32xbf16, #tpu.memory_space<vmem>>, vector<1x256x32xbf16>
    %62 = vector.shape_cast %61 : vector<1x256x32xbf16> to vector<256x32xbf16>
    %cst_30 = arith.constant dense<0.000000e+00> : vector<2x32xf32>
    %63 = tpu.matmul %60, %62, %cst_30 {dimension_numbers = #tpu.dot_dimension_numbers<[1], [0], [0], [1], [0, 0, 1, 1], [], []>} : vector<2x256xbf16>, vector<256x32xbf16>, vector<2x32xf32> -> vector<2x32xf32>
    %64 = arith.addf %58, %63 : vector<2x32xf32>
    %c0_31 = arith.constant 0 : index
    %c0_32 = arith.constant 0 : index
    %65 = vector.load %arg4[%c0_31, %c0_32] : memref<1x32xf32, #tpu.memory_space<vmem>>, vector<1x32xf32>
    %66 = vector.broadcast %65 : vector<1x32xf32> to vector<2x32xf32>
    %67 = arith.addf %64, %66 : vector<2x32xf32>
    %cst_33 = arith.constant 0.000000e+00 : f32
    %68 = vector.broadcast %cst_33 : f32 to vector<2x32xf32>
    %69 = arith.maximumf %67, %68 : vector<2x32xf32>
    %c0_34 = arith.constant 0 : index
    %c0_35 = arith.constant 0 : index
    %70 = vector.load %arg5[%c0_34, %c0_35] : memref<32x10xf32, #tpu.memory_space<vmem>>, vector<32x10xf32>
    %cst_36 = arith.constant dense<0.000000e+00> : vector<2x10xf32>
    %71 = tpu.matmul %69, %70, %cst_36 {dimension_numbers = #tpu.dot_dimension_numbers<[1], [0], [0], [1], [0, 0, 1, 1], [], []>} : vector<2x32xf32>, vector<32x10xf32>, vector<2x10xf32> -> vector<2x10xf32>
    %c0_37 = arith.constant 0 : index
    %c0_38 = arith.constant 0 : index
    %72 = vector.load %arg6[%c0_37, %c0_38] : memref<1x10xf32, #tpu.memory_space<vmem>>, vector<1x10xf32>
    %73 = vector.broadcast %72 : vector<1x10xf32> to vector<2x10xf32>
    %74 = arith.addf %71, %73 : vector<2x10xf32>
    %cst_39 = arith.constant 0.000000e+00 : f32
    %75 = vector.broadcast %cst_39 : f32 to vector<2x10xf32>
    %76 = arith.maximumf %74, %75 : vector<2x10xf32>
    %c0_40 = arith.constant 0 : index
    %c0_41 = arith.constant 0 : index
    %77 = vector.load %arg7[%c0_40, %c0_41] : memref<2x10xf32, #tpu.memory_space<vmem>>, vector<2x10xf32>
    tpu.vector_store %arg7[%c0_40, %c0_41], %76 {strides = array<i32>} : memref<2x10xf32, #tpu.memory_space<vmem>>, vector<2x10xf32>,
    return
  }
  func.func @transform_0(%arg0: i32) -> (i32, i32) {
    %c0_i32 = arith.constant 0 : i32
    %c0_i32_0 = arith.constant 0 : i32
    %c0_i32_1 = arith.constant 0 : i32
    return %c0_i32, %c0_i32_0 : i32, i32
  }
  func.func @transform_1(%arg0: i32) -> (i32, i32) {
    %c0_i32 = arith.constant 0 : i32
    %c0_i32_0 = arith.constant 0 : i32
    %c0_i32_1 = arith.constant 0 : i32
    return %c0_i32, %c0_i32_0 : i32, i32
  }
  func.func @transform_2(%arg0: i32) -> (i32, i32, i32) {
    %c0_i32 = arith.constant 0 : i32
    %c0_i32_0 = arith.constant 0 : i32
    %c0_i32_1 = arith.constant 0 : i32
    %c0_i32_2 = arith.constant 0 : i32
    return %c0_i32, %c0_i32_0, %c0_i32_1 : i32, i32, i32
  }
  func.func @transform_3(%arg0: i32) -> (i32, i32) {
    %c0_i32 = arith.constant 0 : i32
    %c0_i32_0 = arith.constant 0 : i32
    %c0_i32_1 = arith.constant 0 : i32
    return %c0_i32, %c0_i32_0 : i32, i32
  }
  func.func @transform_4(%arg0: i32) -> (i32, i32) {
    %c0_i32 = arith.constant 0 : i32
    %c0_i32_0 = arith.constant 0 : i32
    %c0_i32_1 = arith.constant 0 : i32
    return %c0_i32, %c0_i32_0 : i32, i32
  }
  func.func @transform_5(%arg0: i32) -> (i32, i32) {
    %c0_i32 = arith.constant 0 : i32
    %c0_i32_0 = arith.constant 0 : i32
    %c0_i32_1 = arith.constant 0 : i32
    return %c0_i32, %c0_i32_0 : i32, i32
  }
  func.func @transform_6(%arg0: i32) -> (i32, i32) {
    %c0_i32 = arith.constant 0 : i32
    %c0_i32_0 = arith.constant 0 : i32
    %c0_i32_1 = arith.constant 0 : i32
    return %c0_i32, %c0_i32_0 : i32, i32
  }
}

</mosaic_0001>

<bundles_post_ra>
// kernel: forward.1
= control target key start
LH: loop header
LB: loop body
LE: loop exit
PB: predicated region body
PF: predicated region fallthrough
CT: control target
= control target key end

     0   :  { %s2933_s0 = inlined_call_operand.vmem [shape: f32[8,256], index: 0, kind: input, shape index: {}]   ;;  %s2934_s1 = inlined_call_operand.vmem [shape: bf16[16,73], index: 1, kind: input, shape index: {}]   ;;  %s2935_s2 = inlined_call_operand.vmem [shape: bf16[8,256,32], index: 2, kind: input, shape index: {}]   ;;  %s2936_s3 = inlined_call_operand.vmem [shape: f32[1,32], index: 3, kind: input, shape index: {}]   ;;  %s2937_s4 = inlined_call_operand.vmem [shape: f32[32,10], index: 4, kind: input, shape index: {}]   ;;  %s2938_s5 = inlined_call_operand.vmem [shape: f32[1,10], index: 5, kind: input, shape index: {}]   ;;  %s2939_s6 = inlined_call_operand.hbm [shape: f32[2,10], index: 6, kind: output, shape index: {}]  }
   0x1   :  { %v2480_v0 = vld [vmem:[%s2933_s0] sm:$0xff]  ;;  %v2485_v1 = vld [vmem:[%s2933_s0 + $0x8] sm:$0xff] }
   0x2   :  { %v2374_v2 = vpack.i.bf16 %v2485_v1, %v2480_v0 }
   0x3   :  { %11 = vsyncpa [#allocation3], 0  ;;  %s2432_s25 = smov 95   ;;  %s2433_s26 = smov 94   ;;  %v31_v3 = vlaneseq  ;;  %vm106_vm0 = vcmask 1043456   ;;  %v2249_v6 = vld [vmem:[%s2935_s2 + $0xb8] sm:$0xff] }
   0x4   :  { %2375 = vrot.lane.b32.xlu1 %v2374_v2, %s2432_s25  ;;  %2365 = vrot.lane.b32.xlu0 %v2374_v2, %s2433_s26  ;;  %s2434_s27 = smov 110   ;;  %s2435_s28 = smov 111   ;;  %v2257_v7 = vld [vmem:[%s2935_s2 + $0xf8] sm:$0xff]  ;;  %v2248_v8 = vld [vmem:[%s2935_s2 + $0xb0] sm:$0xff]  ;;  %vm107_vm2 = vcmask 1044480   ;;  %v2440_v11 = vmov 65535  }
   0x5   :  { %2385 = vrot.lane.b32.xlu2 %v2374_v2, %s2434_s27  ;;  %s2436_s29 = smov 96   ;;  %s2437_s30 = smov 126   ;;  %v2489_v4 = vand.u32 127, %v31_v3  ;;  %317 = vmatpush.bf16.msra.mxu2 %v2249_v6  ;;  %v108_v12 = vsel %vm106_vm0, 4294967295, %v2440_v11  ;;  %v2256_v13 = vld [vmem:[%s2935_s2 + $0xf0] sm:$0xff]  ;;  %v2247_v19 = vld [vmem:[%s2935_s2 + $0xa8] sm:$0xff] }
   0x6   :  { %s2438_s7 = smov 112   ;;  %s2439_s0 = smov 127   ;;  %330 = vmatpush.bf16.msra.mxu3 %v2257_v7  ;;  %v109_v17 = vsel %vm107_vm2, %v108_v12, 0  ;;  %v2255_v22 = vld [vmem:[%s2935_s2 + $0xe8] sm:$0xff]  ;;  %v2246_v28 = vld [vmem:[%s2935_s2 + $0xa0] sm:$0xff]  ;;  %v2245_v44 = vld [vmem:[%s2935_s2 + $0x98] sm:$0xff] }
   0x7   :  { %vm82_vm1 = vcmp.lt.s32.totalorder %v2489_v4, 94  ;;  %vm68_vm3 = vcmp.lt.s32.totalorder %v2489_v4, 96  ;;  %vm75_vm4 = vcmp.lt.s32.totalorder %v2489_v4, 95  ;;  %v2254_v37 = vld [vmem:[%s2935_s2 + $0xe0] sm:$0xff]  ;;  %vm54_vm5 = vcmp.lt.s32.totalorder %v2489_v4, 111  ;;  %v2253_v51 = vld [vmem:[%s2935_s2 + $0xd8] sm:$0xff] }
   0x8   :  { %vm61_vm6 = vcmp.lt.s32.totalorder %v2489_v4, 110  ;;  %vm40_vm7 = vcmp.lt.s32.totalorder %v2489_v4, 126  ;;  %vm47_vm8 = vcmp.lt.s32.totalorder %v2489_v4, 112  ;;  %v2244_v53 = vld [vmem:[%s2935_s2 + $0x90] sm:$0xff]  ;;  %vm33_vm9 = vcmp.lt.s32.totalorder %v2489_v4, 127  ;;  %v2243_v7 = vld [vmem:[%s2935_s2 + $0x88] sm:$0xff] }
   0x9   :  { %318 = vmatpush.bf16.msra.mxu2 %v2248_v8  ;;  %v2252_v63 = vld [vmem:[%s2935_s2 + $0xd0] sm:$0xff]  ;;  %v2233_v12 = vld [vmem:[%s2935_s2 + $0x38] sm:$0xff]  ;;  %vm102_vm10 = vcmask 596992   ;;  %vm1439_vm11 = vcmask 261120   ;;  %s2441_s17 = smov [#allocation2]   ;;  %s1473_s21 = sshll.u32 %s2939_s6, 4  ;;  %s1474_s21 = int_to_ptr.hbm [resolvable:$true] %s1473_s21 }
   0xa   :  { %331 = vmatpush.bf16.msra.mxu3 %v2256_v13  ;;  %v2241_v13 = vld [vmem:[%s2935_s2 + $0x78] sm:$0xff]  ;;  %s1471_s18 = sshll.u32 %s2441_s17, 4  ;;  %vm1464_vm12 = vcmask 74752   ;;  %s1472_s18 = int_to_ptr.vmem [resolvable:$true] %s1471_s18 }
   0xc   :  { %2380 = vrot.lane.b32.xlu1 %v2374_v2, %s2435_s28  ;;  %2370 = vrot.lane.b32.xlu0 %v2374_v2, %s2436_s29 }
   0xd   :  { %2390 = vrot.lane.b32.xlu2 %v2374_v2, %s2437_s30  ;;  %319 = vmatpush.bf16.msra.mxu2 %v2247_v19  ;;  %v2264_v19 = vld [vmem:[%s2935_s2 + $0x130] sm:$0xff] }
   0xe   :  { %332 = vmatpush.bf16.msra.mxu3 %v2255_v22  ;;  %v2272_v22 = vld [vmem:[%s2935_s2 + $0x170] sm:$0xff] }
  0x11   :  { %320 = vmatpush.bf16.msra.mxu2 %v2246_v28  ;;  %v2229_v28 = vld [vmem:[%s2935_s2 + $0x18] sm:$0xff] }
  0x12   :  { %333 = vmatpush.bf16.msra.mxu3 %v2254_v37  ;;  %v2235_v37 = vld [vmem:[%s2935_s2 + $0x48] sm:$0xff] }
  0x14   :  { %2395 = vrot.lane.b32.xlu0 %v2374_v2, %s2438_s7  ;;  %2400 = vrot.lane.b32.xlu1 %v2374_v2, %s2439_s0 }
  0x15   :  { %321 = vmatpush.bf16.msra.mxu2 %v2245_v44  ;;  %v2288_v44 = vld [vmem:[%s2935_s2 + $0x1f0] sm:$0xff] }
  0x16   :  { %334 = vmatpush.bf16.msra.mxu3 %v2253_v51  ;;  %v2276_v51 = vld [vmem:[%s2935_s2 + $0x190] sm:$0xff] }
  0x19   :  { %322 = vmatpush.bf16.msra.mxu2 %v2244_v53  ;;  %v2275_v53 = vld [vmem:[%s2935_s2 + $0x188] sm:$0xff] }
  0x1a   :  { %335 = vmatpush.bf16.msra.mxu3 %v2252_v63 }
  0x1d   :  { %323 = vmatpush.bf16.msra.mxu2 %v2243_v7 }
  0x5f   :  { %v2491_v5 = vpop.permute.xlu2 %2385 }
  0x60   :  { %v2388_v29 = vunpack.i.h.bf16 %v2491_v5  ;;  %v2387_v30 = vunpack.i.l.bf16 %v2491_v5 }
  0x62   :  { %v62_v48 = vsel %vm61_vm6, %v2387_v30, %v2388_v29  ;;  %v63_v50 = vsel %vm61_vm6, %v2388_v29, %v2387_v30  ;;  %v2237_v29 = vld [vmem:[%s2935_s2 + $0x58] sm:$0xff]  ;;  %v2270_v30 = vld [vmem:[%s2935_s2 + $0x160] sm:$0xff] }
  0x67   :  { %v2391_v27 = vpop.permute.xlu2 %2390 }
  0x68   :  { %v2393_v38 = vunpack.i.h.bf16 %v2391_v27  ;;  %v2392_v39 = vunpack.i.l.bf16 %v2391_v27  ;;  %v2262_v27 = vld [vmem:[%s2935_s2 + $0x120] sm:$0xff] }
  0x6a   :  { %v41_v52 = vsel %vm40_vm7, %v2392_v39, %v2393_v38  ;;  %v42_v58 = vsel %vm40_vm7, %v2393_v38, %v2392_v39  ;;  %v2268_v38 = vld [vmem:[%s2935_s2 + $0x150] sm:$0xff]  ;;  %v2226_v39 = vld [vmem:[%s2935_s2] sm:$0xff] }
  0x76   :  { %v2376_v9 = vpop.permute.xlu1 %2375  ;;  %v2366_v10 = vpop.permute.xlu0 %2365 }
  0x77   :  { %v2368_v14 = vunpack.i.h.bf16 %v2366_v10  ;;  %v2367_v15 = vunpack.i.l.bf16 %v2366_v10  ;;  %v2378_v25 = vunpack.i.h.bf16 %v2376_v9  ;;  %v2377_v26 = vunpack.i.l.bf16 %v2376_v9  ;;  %v2251_v10 = vld [vmem:[%s2935_s2 + $0xc8] sm:$0xff] }
  0x78   :  { %336 = vmatpush.bf16.msra.mxu3 %v2251_v10 }
  0x79   :  { %v83_v16 = vsel %vm82_vm1, %v2367_v15, %v2368_v14  ;;  %v84_v18 = vsel %vm82_vm1, %v2368_v14, %v2367_v15  ;;  %v76_v41 = vsel %vm75_vm4, %v2377_v26, %v2378_v25  ;;  %v77_v43 = vsel %vm75_vm4, %v2378_v25, %v2377_v26  ;;  %v2242_v14 = vld [vmem:[%s2935_s2 + $0x80] sm:$0xff]  ;;  %v2271_v26 = vld [vmem:[%s2935_s2 + $0x168] sm:$0xff] }
  0x7a   :  { %v93_v20 = vpack.c.bf16 1.0, %v83_v16  ;;  %v94_v21 = vpack.c.bf16 1.0, %v84_v18  ;;  %v2225_v15 = vld [vmem:[%s2934_s1] sm:$0xff]  ;;  %v2232_v16 = vld [vmem:[%s2935_s2 + $0x30] sm:$0xff]  ;;  %324 = vmatpush.bf16.msra.mxu2 %v2242_v14  ;;  %v2273_v18 = vld [vmem:[%s2935_s2 + $0x178] sm:$0xff] }
  0x7b   :  { %v2238_v25 = vld [vmem:[%s2935_s2 + $0x60] sm:$0xff]  ;;  %v2304_v14 = vld [vmem:[%s2935_s2 + $0x270] sm:$0xff] }
  0x7c   :  { %v111_v23 = vand.u32 %v109_v17, %v93_v20  ;;  %v114_v24 = vand.u32 %v109_v17, %v94_v21  ;;  %v2240_v17 = vld [vmem:[%s2935_s2 + $0x70] sm:$0xff]  ;;  %v2231_v20 = vld [vmem:[%s2935_s2 + $0x28] sm:$0xff] }
  0x7d   :  { %v2239_v21 = vld [vmem:[%s2935_s2 + $0x68] sm:$0xff] }
  0x7e   :  { %v2381_v31 = vpop.permute.xlu1 %2380  ;;  %v2371_v32 = vpop.permute.xlu0 %2370  ;;  %119 = vmatpush.bf16.msra.mxu0 %v111_v23  ;;  %133 = vmatpush.bf16.msra.mxu1 %v114_v24  ;;  %v2263_v23 = vld [vmem:[%s2935_s2 + $0x128] sm:$0xff]  ;;  %v2230_v24 = vld [vmem:[%s2935_s2 + $0x20] sm:$0xff] }
  0x7f   :  { %v2383_v33 = vunpack.i.h.bf16 %v2381_v31  ;;  %v2382_v34 = vunpack.i.l.bf16 %v2381_v31  ;;  %v2373_v35 = vunpack.i.h.bf16 %v2371_v32  ;;  %v2372_v36 = vunpack.i.l.bf16 %v2371_v32  ;;  %v2261_v31 = vld [vmem:[%s2935_s2 + $0x118] sm:$0xff]  ;;  %v2228_v32 = vld [vmem:[%s2935_s2 + $0x10] sm:$0xff] }
  0x81   :  { %v69_v40 = vsel %vm68_vm3, %v2372_v36, %v2373_v35  ;;  %v70_v42 = vsel %vm68_vm3, %v2373_v35, %v2372_v36  ;;  %v55_v47 = vsel %vm54_vm5, %v2382_v34, %v2383_v33  ;;  %v56_v49 = vsel %vm54_vm5, %v2383_v33, %v2382_v34  ;;  %v2236_v33 = vld [vmem:[%s2935_s2 + $0x50] sm:$0xff]  ;;  %v2269_v34 = vld [vmem:[%s2935_s2 + $0x158] sm:$0xff]  ;;  %v2227_v36 = vld [vmem:[%s2935_s2 + $0x8] sm:$0xff] }
  0x82   :  { %v91_v45 = vpack.c.bf16 %v76_v41, %v69_v40  ;;  %v92_v46 = vpack.c.bf16 %v77_v43, %v70_v42  ;;  %v89_v55 = vpack.c.bf16 %v62_v48, %v55_v47  ;;  %v90_v56 = vpack.c.bf16 %v63_v50, %v56_v49  ;;  %v2260_v35 = vld [vmem:[%s2935_s2 + $0x110] sm:$0xff]  ;;  %v2234_v40 = vld [vmem:[%s2935_s2 + $0x40] sm:$0xff]  ;;  %v2281_v41 = vld [vmem:[%s2935_s2 + $0x1b8] sm:$0xff] }
  0x83   :  { %v2289_v42 = vld [vmem:[%s2935_s2 + $0x1f8] sm:$0xff]  ;;  %v2280_v43 = vld [vmem:[%s2935_s2 + $0x1b0] sm:$0xff]  ;;  %v2278_v47 = vld [vmem:[%s2935_s2 + $0x1a0] sm:$0xff] }
  0x84   :  { %120 = vmatpush.bf16.msra.mxu0 %v91_v45  ;;  %134 = vmatpush.bf16.msra.mxu1 %v92_v46  ;;  %v2279_v45 = vld [vmem:[%s2935_s2 + $0x1a8] sm:$0xff]  ;;  %v2286_v48 = vld [vmem:[%s2935_s2 + $0x1e0] sm:$0xff]  ;;  %v2277_v49 = vld [vmem:[%s2935_s2 + $0x198] sm:$0xff] }
  0x85   :  { %v2287_v46 = vld [vmem:[%s2935_s2 + $0x1e8] sm:$0xff]  ;;  %v2285_v50 = vld [vmem:[%s2935_s2 + $0x1d8] sm:$0xff] }
  0x86   :  { %v2396_v54 = vpop.permute.xlu0 %2395  ;;  %v2401_v57 = vpop.permute.xlu1 %2400 }
  0x87   :  { %v2398_v59 = vunpack.i.h.bf16 %v2396_v54  ;;  %v2397_v60 = vunpack.i.l.bf16 %v2396_v54  ;;  %v2403_v61 = vunpack.i.h.bf16 %v2401_v57  ;;  %v2402_v62 = vunpack.i.l.bf16 %v2401_v57  ;;  %v2283_v54 = vld [vmem:[%s2935_s2 + $0x1c8] sm:$0xff]  ;;  %v2274_v57 = vld [vmem:[%s2935_s2 + $0x180] sm:$0xff] }
  0x88   :  { %121 = vmatpush.bf16.msra.mxu0 %v89_v55  ;;  %135 = vmatpush.bf16.msra.mxu1 %v90_v56  ;;  %v2259_v55 = vld [vmem:[%s2935_s2 + $0x108] sm:$0xff] }
  0x89   :  { %v48_v2 = vsel %vm47_vm8, %v2397_v60, %v2398_v59  ;;  %v49_v3 = vsel %vm47_vm8, %v2398_v59, %v2397_v60  ;;  %v34_v5 = vsel %vm33_vm9, %v2402_v62, %v2403_v61  ;;  %v35_v6 = vsel %vm33_vm9, %v2403_v61, %v2402_v62  ;;  %v2267_v56 = vld [vmem:[%s2935_s2 + $0x148] sm:$0xff]  ;;  %v2258_v59 = vld [vmem:[%s2935_s2 + $0x100] sm:$0xff] }
  0x8a   :  { %v87_v8 = vpack.c.bf16 %v48_v2, %v41_v52  ;;  %v88_v9 = vpack.c.bf16 %v49_v3, %v42_v58  ;;  %v85_v11 = vpack.c.bf16 %v34_v5, %v2480_v0  ;;  %v86_v4 = vpack.c.bf16 %v35_v6, %v2485_v1  ;;  %v2250_v0 = vld [vmem:[%s2935_s2 + $0xc0] sm:$0xff]  ;;  %v2265_v1 = vld [vmem:[%s2935_s2 + $0x138] sm:$0xff]  ;;  %v2284_v52 = vld [vmem:[%s2935_s2 + $0x1d0] sm:$0xff] }
  0x8b   :  { %337 = vmatpush.bf16.msra.mxu3 %v2250_v0  ;;  %598 = vmatpush.bf16.msrb.mxu2 %v2265_v1  ;;  %v2282_v58 = vld [vmem:[%s2935_s2 + $0x1c0] sm:$0xff]  ;;  %v2313_v3 = vld [vmem:[%s2935_s2 + $0x2b8] sm:$0xff]  ;;  %v2319_v0 = vld [vmem:[%s2935_s2 + $0x2e8] sm:$0xff] }
  0x8c   :  { %122 = vmatpush.bf16.msra.mxu0 %v87_v8  ;;  %136 = vmatpush.bf16.msra.mxu1 %v88_v9  ;;  %v2266_v60 = vld [vmem:[%s2935_s2 + $0x140] sm:$0xff]  ;;  %v2321_v5 = vld [vmem:[%s2935_s2 + $0x2f8] sm:$0xff]  ;;  %v2295_v1 = vld [vmem:[%s2935_s2 + $0x228] sm:$0xff] }
  0x8d   :  { %v2297_v8 = vld [vmem:[%s2935_s2 + $0x238] sm:$0xff] }
  0x8e   :  { %v2305_v9 = vld [vmem:[%s2935_s2 + $0x278] sm:$0xff] }
  0x8f   :  { %611 = vmatpush.bf16.msrb.mxu3 %v2273_v18  ;;  %599 = vmatpush.bf16.msrb.mxu2 %v2264_v19  ;;  %v2318_v18 = vld [vmem:[%s2935_s2 + $0x2e0] sm:$0xff] }
  0x90   :  { %123 = vmatpush.bf16.msra.mxu0 %v85_v11  ;;  %137 = vmatpush.bf16.msra.mxu1 %v86_v4  ;;  %v2312_v4 = vld [vmem:[%s2935_s2 + $0x2b0] sm:$0xff]  ;;  %v2294_v19 = vld [vmem:[%s2935_s2 + $0x220] sm:$0xff] }
  0x93   :  { %1486 = vmatmul.msk.bf16.vlgmr.msra.gmra.mxu0 %vm102_vm10, %v2225_v15  ;;  %1487 = vmatmul.msk.bf16.vlgmr.msra.gmra.mxu1 %vm102_vm10, %v2225_v15  ;;  %v2311_v15 = vld [vmem:[%s2935_s2 + $0x2a8] sm:$0xff] }
  0x94   :  { %439 = vmatpush.bf16.msrb.mxu0 %v2233_v12  ;;  %452 = vmatpush.bf16.msrb.mxu1 %v2241_v13  ;;  %v2320_v12 = vld [vmem:[%s2935_s2 + $0x2f0] sm:$0xff] }
  0x95   :  { %612 = vmatpush.bf16.msrb.mxu3 %v2272_v22  ;;  %600 = vmatpush.bf16.msrb.mxu2 %v2263_v23  ;;  %v2296_v13 = vld [vmem:[%s2935_s2 + $0x230] sm:$0xff]  ;;  %v2317_v22 = vld [vmem:[%s2935_s2 + $0x2d8] sm:$0xff] }
  0x98   :  { %440 = vmatpush.bf16.msrb.mxu0 %v2232_v16  ;;  %453 = vmatpush.bf16.msrb.mxu1 %v2240_v17  ;;  %v2303_v16 = vld [vmem:[%s2935_s2 + $0x268] sm:$0xff]  ;;  %v2310_v17 = vld [vmem:[%s2935_s2 + $0x2a0] sm:$0xff] }
  0x99   :  { %613 = vmatpush.bf16.msrb.mxu3 %v2271_v26  ;;  %601 = vmatpush.bf16.msrb.mxu2 %v2262_v27  ;;  %v2301_v26 = vld [vmem:[%s2935_s2 + $0x258] sm:$0xff] }
  0x9c   :  { %441 = vmatpush.bf16.msrb.mxu0 %v2231_v20  ;;  %454 = vmatpush.bf16.msrb.mxu1 %v2239_v21  ;;  %v2302_v20 = vld [vmem:[%s2935_s2 + $0x260] sm:$0xff]  ;;  %v2309_v21 = vld [vmem:[%s2935_s2 + $0x298] sm:$0xff] }
  0x9d   :  { %614 = vmatpush.bf16.msrb.mxu3 %v2270_v30  ;;  %602 = vmatpush.bf16.msrb.mxu2 %v2261_v31  ;;  %v2316_v30 = vld [vmem:[%s2935_s2 + $0x2d0] sm:$0xff] }
  0x9e   :  { %v2292_v31 = vld [vmem:[%s2935_s2 + $0x210] sm:$0xff] }
  0xa0   :  { %442 = vmatpush.bf16.msrb.mxu0 %v2230_v24  ;;  %455 = vmatpush.bf16.msrb.mxu1 %v2238_v25  ;;  %v2293_v25 = vld [vmem:[%s2935_s2 + $0x218] sm:$0xff] }
  0xa1   :  { %615 = vmatpush.bf16.msrb.mxu3 %v2269_v34  ;;  %603 = vmatpush.bf16.msrb.mxu2 %v2260_v35  ;;  %v2307_v35 = vld [vmem:[%s2935_s2 + $0x288] sm:$0xff] }
  0xa4   :  { %443 = vmatpush.bf16.msrb.mxu0 %v2229_v28  ;;  %456 = vmatpush.bf16.msrb.mxu1 %v2237_v29  ;;  %v2308_v29 = vld [vmem:[%s2935_s2 + $0x290] sm:$0xff] }
  0xa5   :  { %616 = vmatpush.bf16.msrb.mxu3 %v2268_v38  ;;  %604 = vmatpush.bf16.msrb.mxu2 %v2259_v55  ;;  %v2328_v55 = vld [vmem:[%s2935_s2 + $0x330] sm:$0xff] }
  0xa8   :  { %444 = vmatpush.bf16.msrb.mxu0 %v2228_v32  ;;  %457 = vmatpush.bf16.msrb.mxu1 %v2236_v33  ;;  %v2300_v32 = vld [vmem:[%s2935_s2 + $0x250] sm:$0xff] }
  0xa9   :  { %617 = vmatpush.bf16.msrb.mxu3 %v2267_v56  ;;  %605 = vmatpush.bf16.msrb.mxu2 %v2258_v59  ;;  %v2336_v56 = vld [vmem:[%s2935_s2 + $0x370] sm:$0xff]  ;;  %v2327_v59 = vld [vmem:[%s2935_s2 + $0x328] sm:$0xff] }
  0xac   :  { %445 = vmatpush.bf16.msrb.mxu0 %v2227_v36  ;;  %458 = vmatpush.bf16.msrb.mxu1 %v2235_v37  ;;  %v2315_v36 = vld [vmem:[%s2935_s2 + $0x2c8] sm:$0xff] }
  0xad   :  { %618 = vmatpush.bf16.msrb.mxu3 %v2266_v60  ;;  %v2335_v60 = vld [vmem:[%s2935_s2 + $0x368] sm:$0xff] }
  0xb0   :  { %446 = vmatpush.bf16.msrb.mxu0 %v2226_v39  ;;  %459 = vmatpush.bf16.msrb.mxu1 %v2234_v40  ;;  %v2291_v39 = vld [vmem:[%s2935_s2 + $0x208] sm:$0xff] }
  0xb1   :  { %v2299_v40 = vld [vmem:[%s2935_s2 + $0x248] sm:$0xff] }
  0xb4   :  { %758 = vmatpush.bf16.msra.mxu0 %v2281_v41  ;;  %771 = vmatpush.bf16.msra.mxu1 %v2289_v42  ;;  %v2306_v41 = vld [vmem:[%s2935_s2 + $0x280] sm:$0xff] }
  0xb5   :  { %v2314_v42 = vld [vmem:[%s2935_s2 + $0x2c0] sm:$0xff] }
  0xb8   :  { %759 = vmatpush.bf16.msra.mxu0 %v2280_v43  ;;  %772 = vmatpush.bf16.msra.mxu1 %v2288_v44  ;;  %v2345_v43 = vld [vmem:[%s2935_s2 + $0x3b8] sm:$0xff] }
  0xb9   :  { %v2353_v44 = vld [vmem:[%s2935_s2 + $0x3f8] sm:$0xff] }
  0xbc   :  { %760 = vmatpush.bf16.msra.mxu0 %v2279_v45  ;;  %773 = vmatpush.bf16.msra.mxu1 %v2287_v46 }
  0xc0   :  { %761 = vmatpush.bf16.msra.mxu0 %v2278_v47  ;;  %774 = vmatpush.bf16.msra.mxu1 %v2286_v48  ;;  %v2290_v47 = vld [vmem:[%s2935_s2 + $0x200] sm:$0xff] }
  0xc1   :  { %v2298_v48 = vld [vmem:[%s2935_s2 + $0x240] sm:$0xff] }
  0xc4   :  { %762 = vmatpush.bf16.msra.mxu0 %v2277_v49  ;;  %775 = vmatpush.bf16.msra.mxu1 %v2285_v50  ;;  %v2329_v49 = vld [vmem:[%s2935_s2 + $0x338] sm:$0xff] }
  0xc5   :  { %v2337_v50 = vld [vmem:[%s2935_s2 + $0x378] sm:$0xff] }
  0xc8   :  { %763 = vmatpush.bf16.msra.mxu0 %v2276_v51  ;;  %776 = vmatpush.bf16.msra.mxu1 %v2284_v52  ;;  %v2344_v51 = vld [vmem:[%s2935_s2 + $0x3b0] sm:$0xff] }
  0xc9   :  { %v2352_v52 = vld [vmem:[%s2935_s2 + $0x3f0] sm:$0xff] }
  0xcc   :  { %764 = vmatpush.bf16.msra.mxu0 %v2275_v53  ;;  %777 = vmatpush.bf16.msra.mxu1 %v2283_v54 }
  0xd0   :  { %765 = vmatpush.bf16.msra.mxu0 %v2274_v57  ;;  %778 = vmatpush.bf16.msra.mxu1 %v2282_v58  ;;  %v2343_v57 = vld [vmem:[%s2935_s2 + $0x3a8] sm:$0xff] }
  0xd1   :  { %v2351_v58 = vld [vmem:[%s2935_s2 + $0x3e8] sm:$0xff] }
 0x110   :  { %v125_v61 = vpop.f32.mrf.mxu0  ;;  %v139_v62 = vpop.f32.mrf.mxu1 }
 0x111   :  { %v144_v63 = vmax.f32 %v125_v61, 0.0  ;;  %v145_v2 = vmax.f32 %v139_v62, 0.0  ;;  %v2342_v61 = vld [vmem:[%s2935_s2 + $0x3a0] sm:$0xff] }
 0x112   :  { %v2350_v62 = vld [vmem:[%s2935_s2 + $0x3e0] sm:$0xff] }
 0x113   :  { %v148_v6 = vpack.c.bf16 %v144_v63, %v144_v63  ;;  %v149_v7 = vpack.c.bf16 %v145_v2, %v145_v2  ;;  %v2326_v63 = vld [vmem:[%s2935_s2 + $0x320] sm:$0xff] }
 0x114   :  { %v2334_v2 = vld [vmem:[%s2935_s2 + $0x360] sm:$0xff] }
 0x115   :  { %447 = vmatmul.bf16.vlgmr.msrb.gmra.mxu0 %v148_v6  ;;  %460 = vmatmul.bf16.vlgmr.msrb.gmra.mxu1 %v149_v7  ;;  %v217_v10 = vrot.slane %v148_v6, 1  ;;  %v218_v11 = vrot.slane %v149_v7, 1  ;;  %v658_v23 = vrot.slane %v148_v6, 3  ;;  %v659_v24 = vrot.slane %v149_v7, 3 }
 0x116   :  { %1078 = vmatpush.bf16.msrb.mxu0 %v2313_v3  ;;  %1091 = vmatpush.bf16.msrb.mxu1 %v2321_v5  ;;  %v498_v27 = vrot.slane %v148_v6, 2  ;;  %v499_v28 = vrot.slane %v149_v7, 2  ;;  %v2341_v3 = vld [vmem:[%s2935_s2 + $0x398] sm:$0xff] }
 0x117   :  { %325 = vmatmul.bf16.vlgmr.msra.gmra.mxu2 %v217_v10  ;;  %338 = vmatmul.bf16.vlgmr.msra.gmra.mxu3 %v218_v11  ;;  %v2349_v5 = vld [vmem:[%s2935_s2 + $0x3d8] sm:$0xff]  ;;  %v2324_v10 = vld [vmem:[%s2935_s2 + $0x310] sm:$0xff] }
 0x118   :  { %916 = vmatpush.bf16.msra.mxu2 %v2297_v8  ;;  %929 = vmatpush.bf16.msra.mxu3 %v2305_v9  ;;  %v127_v33 = vpop.f32.mrf.mxu0  ;;  %v141_v34 = vpop.f32.mrf.mxu1  ;;  %v2325_v6 = vld [vmem:[%s2935_s2 + $0x318] sm:$0xff]  ;;  %v2340_v8 = vld [vmem:[%s2935_s2 + $0x390] sm:$0xff] }
 0x119   :  { %v146_v37 = vmax.f32 %v127_v33, 0.0  ;;  %v147_v38 = vmax.f32 %v141_v34, 0.0  ;;  %v2333_v7 = vld [vmem:[%s2935_s2 + $0x358] sm:$0xff]  ;;  %v2348_v9 = vld [vmem:[%s2935_s2 + $0x3d0] sm:$0xff] }
 0x11a   :  { %1079 = vmatpush.bf16.msrb.mxu0 %v2312_v4  ;;  %1092 = vmatpush.bf16.msrb.mxu1 %v2320_v12  ;;  %v2332_v11 = vld [vmem:[%s2935_s2 + $0x350] sm:$0xff]  ;;  %v2339_v4 = vld [vmem:[%s2935_s2 + $0x388] sm:$0xff] }
 0x11b   :  { %v2804_v45 = vpack.c.bf16 %v146_v37, %v146_v37  ;;  %v2806_v46 = vpack.c.bf16 %v147_v38, %v147_v38  ;;  %v2347_v12 = vld [vmem:[%s2935_s2 + $0x3c8] sm:$0xff] }
 0x11c   :  { %917 = vmatpush.bf16.msra.mxu2 %v2296_v13  ;;  %930 = vmatpush.bf16.msra.mxu3 %v2304_v14  ;;  %v2323_v13 = vld [vmem:[%s2935_s2 + $0x308] sm:$0xff] }
 0x11d   :  { %v978_v53 = vrot.slane %v2804_v45, 1  ;;  %v979_v54 = vrot.slane %v2806_v46, 1  ;;  %v2331_v14 = vld [vmem:[%s2935_s2 + $0x348] sm:$0xff] }
 0x11e   :  { %1080 = vmatpush.bf16.msrb.mxu0 %v2311_v15  ;;  %1093 = vmatpush.bf16.msrb.mxu1 %v2319_v0  ;;  %v2338_v15 = vld [vmem:[%s2935_s2 + $0x380] sm:$0xff] }
 0x11f   :  { %v2346_v0 = vld [vmem:[%s2935_s2 + $0x3c0] sm:$0xff] }
 0x120   :  { %918 = vmatpush.bf16.msra.mxu2 %v2295_v1  ;;  %931 = vmatpush.bf16.msra.mxu3 %v2303_v16  ;;  %v2322_v1 = vld [vmem:[%s2935_s2 + $0x300] sm:$0xff] }
 0x121   :  { %v2330_v16 = vld [vmem:[%s2935_s2 + $0x340] sm:$0xff] }
 0x122   :  { %1081 = vmatpush.bf16.msrb.mxu0 %v2310_v17  ;;  %1094 = vmatpush.bf16.msrb.mxu1 %v2318_v18  ;;  %v1298_v17 = vrot.slane %v2804_v45, 3  ;;  %v1299_v18 = vrot.slane %v2806_v46, 3 }
 0x124   :  { %919 = vmatpush.bf16.msra.mxu2 %v2294_v19  ;;  %932 = vmatpush.bf16.msra.mxu3 %v2302_v20  ;;  %v1138_v19 = vrot.slane %v2804_v45, 2  ;;  %v1139_v20 = vrot.slane %v2806_v46, 2 }
 0x125   :  { %766 = vmatmul.bf16.vlgmr.msra.gmra.mxu0 %v658_v23  ;;  %779 = vmatmul.bf16.vlgmr.msra.gmra.mxu1 %v659_v24 }
 0x126   :  { %1082 = vmatpush.bf16.msrb.mxu0 %v2309_v21  ;;  %1095 = vmatpush.bf16.msrb.mxu1 %v2317_v22 }
 0x127   :  { %606 = vmatmul.bf16.vlgmr.msrb.gmra.mxu2 %v498_v27  ;;  %619 = vmatmul.bf16.vlgmr.msrb.gmra.mxu3 %v499_v28 }
 0x128   :  { %920 = vmatpush.bf16.msra.mxu2 %v2293_v25  ;;  %933 = vmatpush.bf16.msra.mxu3 %v2301_v26 }
 0x12a   :  { %1083 = vmatpush.bf16.msrb.mxu0 %v2308_v29  ;;  %1096 = vmatpush.bf16.msrb.mxu1 %v2316_v30 }
 0x12c   :  { %921 = vmatpush.bf16.msra.mxu2 %v2292_v31  ;;  %934 = vmatpush.bf16.msra.mxu3 %v2300_v32 }
 0x12e   :  { %1084 = vmatpush.bf16.msrb.mxu0 %v2307_v35  ;;  %1097 = vmatpush.bf16.msrb.mxu1 %v2315_v36  ;;  %v1434_v35 = vld [vmem:[%s2937_s4 + $0x18] sm:$0xff]  ;;  %v1433_v36 = vld [vmem:[%s2937_s4 + $0x10] sm:$0xff] }
 0x130   :  { %922 = vmatpush.bf16.msra.mxu2 %v2291_v39  ;;  %935 = vmatpush.bf16.msra.mxu3 %v2299_v40 }
 0x132   :  { %1085 = vmatpush.bf16.msrb.mxu0 %v2306_v41  ;;  %1098 = vmatpush.bf16.msrb.mxu1 %v2314_v42 }
 0x134   :  { %923 = vmatpush.bf16.msra.mxu2 %v2290_v47  ;;  %936 = vmatpush.bf16.msra.mxu3 %v2298_v48 }
 0x135   :  { %1086 = vmatmul.bf16.vlgmr.msrb.gmra.mxu0 %v978_v53  ;;  %1099 = vmatmul.bf16.vlgmr.msrb.gmra.mxu1 %v979_v54 }
 0x136   :  { %1398 = vmatpush.bf16.msra.mxu0 %v2345_v43  ;;  %1411 = vmatpush.bf16.msra.mxu1 %v2353_v44 }
 0x137   :  { %924 = vmatmul.bf16.vlgmr.msra.gmra.mxu2 %v2804_v45  ;;  %937 = vmatmul.bf16.vlgmr.msra.gmra.mxu3 %v2806_v46  ;;  %v1432_v45 = vld [vmem:[%s2937_s4 + $0x8] sm:$0xff]  ;;  %v1431_v46 = vld [vmem:[%s2937_s4] sm:$0xff] }
 0x138   :  { %1238 = vmatpush.bf16.msrb.mxu2 %v2329_v49  ;;  %1251 = vmatpush.bf16.msrb.mxu3 %v2337_v50 }
 0x13a   :  { %1399 = vmatpush.bf16.msra.mxu0 %v2344_v51  ;;  %1412 = vmatpush.bf16.msra.mxu1 %v2352_v52 }
 0x13c   :  { %1239 = vmatpush.bf16.msrb.mxu2 %v2328_v55  ;;  %1252 = vmatpush.bf16.msrb.mxu3 %v2336_v56 }
 0x13e   :  { %1400 = vmatpush.bf16.msra.mxu0 %v2343_v57  ;;  %1413 = vmatpush.bf16.msra.mxu1 %v2351_v58 }
 0x140   :  { %1240 = vmatpush.bf16.msrb.mxu2 %v2327_v59  ;;  %1253 = vmatpush.bf16.msrb.mxu3 %v2335_v60 }
 0x142   :  { %1401 = vmatpush.bf16.msra.mxu0 %v2342_v61  ;;  %1414 = vmatpush.bf16.msra.mxu1 %v2350_v62 }
 0x144   :  { %1241 = vmatpush.bf16.msrb.mxu2 %v2326_v63  ;;  %1254 = vmatpush.bf16.msrb.mxu3 %v2334_v2 }
 0x146   :  { %1402 = vmatpush.bf16.msra.mxu0 %v2341_v3  ;;  %1415 = vmatpush.bf16.msra.mxu1 %v2349_v5 }
 0x148   :  { %1242 = vmatpush.bf16.msrb.mxu2 %v2325_v6  ;;  %1255 = vmatpush.bf16.msrb.mxu3 %v2333_v7 }
 0x14a   :  { %1403 = vmatpush.bf16.msra.mxu0 %v2340_v8  ;;  %1416 = vmatpush.bf16.msra.mxu1 %v2348_v9  ;;  %v2404_v8 = vld [vmem:[%s2936_s3] ss:$0 sm:$0xff] }
 0x14c   :  { %1243 = vmatpush.bf16.msrb.mxu2 %v2324_v10  ;;  %1256 = vmatpush.bf16.msrb.mxu3 %v2332_v11 }
 0x14e   :  { %1404 = vmatpush.bf16.msra.mxu0 %v2339_v4  ;;  %1417 = vmatpush.bf16.msra.mxu1 %v2347_v12 }
 0x150   :  { %1244 = vmatpush.bf16.msrb.mxu2 %v2323_v13  ;;  %1257 = vmatpush.bf16.msrb.mxu3 %v2331_v14  ;;  %v2405_v13 = vld [vmem:[%s2938_s5] ss:$0 sm:$0xff] }
 0x152   :  { %1405 = vmatpush.bf16.msra.mxu0 %v2338_v15  ;;  %1418 = vmatpush.bf16.msra.mxu1 %v2346_v0 }
 0x154   :  { %1245 = vmatpush.bf16.msrb.mxu2 %v2322_v1  ;;  %1258 = vmatpush.bf16.msrb.mxu3 %v2330_v16 }
 0x155   :  { %1406 = vmatmul.bf16.vlgmr.msra.gmra.mxu0 %v1298_v17  ;;  %1419 = vmatmul.bf16.vlgmr.msra.gmra.mxu1 %v1299_v18 }
 0x157   :  { %1246 = vmatmul.bf16.vlgmr.msrb.gmra.mxu2 %v1138_v19  ;;  %1259 = vmatmul.bf16.vlgmr.msrb.gmra.mxu3 %v1139_v20 }
 0x158   :  { %1455 = vmatpush.msra.mxu2 %v1434_v35 }
 0x15a   :  { %1456 = vmatpush.msra.mxu2 %v1433_v36 }
 0x15c   :  { %1457 = vmatpush.msra.mxu2 %v1432_v45 }
 0x15e   :  { %1458 = vmatpush.msra.mxu2 %v1431_v46 }
 0x192   :  { %v448_v21 = vpop.f32.mrf.mxu0  ;;  %v461_v22 = vpop.f32.mrf.mxu1 }
 0x19a   :  { %v326_v23 = vpop.f32.mrf.mxu2  ;;  %v339_v24 = vpop.f32.mrf.mxu3 }
 0x19b   :  { %v450_v25 = vpop.f32.mrf.mxu0  ;;  %v463_v26 = vpop.f32.mrf.mxu1  ;;  %v340_v49 = vadd.f32 %v339_v24, %v326_v23 }
 0x19d   :  { %v449_v50 = vadd.f32 %v448_v21, %v340_v49 }
 0x19f   :  { %v462_v52 = vadd.f32 %v461_v22, %v449_v50 }
 0x1a2   :  { %v328_v27 = vpop.f32.mrf.mxu2  ;;  %v341_v28 = vpop.f32.mrf.mxu3 }
 0x1a3   :  { %v767_v29 = vpop.f32.mrf.mxu0  ;;  %v780_v30 = vpop.f32.mrf.mxu1 }
 0x1a4   :  { %v781_v56 = vadd.f32 %v780_v30, %v767_v29 }
 0x1aa   :  { %v607_v31 = vpop.f32.mrf.mxu2  ;;  %v620_v32 = vpop.f32.mrf.mxu3 }
 0x1ab   :  { %v769_v33 = vpop.f32.mrf.mxu0  ;;  %v782_v34 = vpop.f32.mrf.mxu1  ;;  %v621_v51 = vadd.f32 %v620_v32, %v607_v31 }
 0x1ad   :  { %v624_v53 = vadd.f32 %v621_v51, %v462_v52 }
 0x1af   :  { %v784_v58 = vadd.f32 %v781_v56, %v624_v53 }
 0x1b2   :  { %v609_v37 = vpop.f32.mrf.mxu2  ;;  %v622_v38 = vpop.f32.mrf.mxu3 }
 0x1b3   :  { %v1087_v39 = vpop.f32.mrf.mxu0  ;;  %v1100_v40 = vpop.f32.mrf.mxu1 }
 0x1b4   :  { %v1101_v60 = vadd.f32 %v1100_v40, %v1087_v39 }
 0x1ba   :  { %v925_v41 = vpop.f32.mrf.mxu2  ;;  %v938_v42 = vpop.f32.mrf.mxu3 }
 0x1bb   :  { %v1089_v43 = vpop.f32.mrf.mxu0  ;;  %v1102_v44 = vpop.f32.mrf.mxu1  ;;  %v939_v57 = vadd.f32 %v938_v42, %v925_v41 }
 0x1bd   :  { %v942_v59 = vadd.f32 %v939_v57, %v784_v58 }
 0x1bf   :  { %v1104_v63 = vadd.f32 %v1101_v60, %v942_v59 }
 0x1c2   :  { %v927_v47 = vpop.f32.mrf.mxu2  ;;  %v940_v48 = vpop.f32.mrf.mxu3 }
 0x1d2   :  { %v1407_v54 = vpop.f32.mrf.mxu0  ;;  %v1420_v55 = vpop.f32.mrf.mxu1 }
 0x1d3   :  { %v1421_v6 = vadd.f32 %v1420_v55, %v1407_v54 }
 0x1da   :  { %v1247_v61 = vpop.f32.mrf.mxu2  ;;  %v1260_v62 = vpop.f32.mrf.mxu3 }
 0x1db   :  { %v1261_v2 = vadd.f32 %v1260_v62, %v1247_v61  ;;  %v1409_v3 = vpop.f32.mrf.mxu0  ;;  %v1422_v5 = vpop.f32.mrf.mxu1 }
 0x1dd   :  { %v1264_v7 = vadd.f32 %v1261_v2, %v1104_v63 }
 0x1df   :  { %v1424_v9 = vadd.f32 %v1421_v6, %v1264_v7 }
 0x1e1   :  { %v1429_v10 = vadd.f32 %v2404_v8, %v1424_v9 }
 0x1e2   :  { %v1249_v11 = vpop.f32.mrf.mxu2  ;;  %v1262_v4 = vpop.f32.mrf.mxu3 }
 0x1e3   :  { %v1430_v12 = vmax.f32 %v1429_v10, 0.0 }
 0x1e5   :  { %2224 = vmatmul.msk.f32.vlgmr.msra.gmra.mxu2 %vm1439_vm11, %v1430_v12 }
 0x268   :  { %v1460_v14 = vpop.f32.mrf.mxu2 }
 0x269   :  { %v1461_v15 = vadd.f32 %v2405_v13, %v1460_v14 }
 0x26b   :  { %v1463_v0 = vmax.f32 %v1461_v15, 0.0 }
 0x26d   :  { %1465 = vst.msk [vmem:[#allocation2] sm:$0x3] %vm1464_vm12, %v1463_v0 }
 0x26e   :  { %1476 = dma.vmem_to_hbm [thread:$0]  %s1472_s18, 32, %s1474_s21, [#allocation3]  }
 0x26f   :  { %2430 = dma.done.wait [#allocation3], 32  }
 0x270   :  { %2431 = vsyncadd [#allocation3], 4294967264 }
 0x271   :  { %1481 = vsyncpa [#allocation3], 1 }

</bundles_post_ra>
